<compile_context>
chip_gen: v6e
topology: v6e:2x2x1
jax: 0.10.0
libtpu: 0.0.40
codegen_flags: <defaults>
</compile_context>

<pallas_src>
import math
import jax
import jax.numpy as jnp
from jax.experimental import pallas as pl
from jax.experimental.pallas import tpu as pltpu

LANE = 128
SUBLANE = 8


def _round_up(n, m):
    return ((n + m - 1) // m) * m


def _pad_to(x, shape):
    pads = [(0, t - s) for s, t in zip(x.shape, shape)]
    if all(p == (0, 0) for p in pads):
        return x
    return jnp.pad(x, pads)


def _vmem_capacity_bytes():
    try:
        return int(pltpu.get_tpu_info().vmem_capacity_bytes)
    except Exception:
        return 64 * 1024 * 1024  # conservative fallback (v7x per-TC VMEM)


def _pick_vocab_tile(vocab, cap):
    """Lane-aligned vocab tile minimizing padded columns (tie-break: bigger tile)."""
    vp128 = _round_up(vocab, LANE)
    best_tv, best_pad = LANE, _round_up(vp128, LANE)
    tv = LANE
    while tv <= min(cap, vp128):
        padded = _round_up(vp128, tv)
        if padded < best_pad or (padded == best_pad and tv > best_tv):
            best_tv, best_pad = tv, padded
        tv += LANE
    return best_tv, best_pad


# ------------------------- Kernel A: adjustment branch -------------------------

def _make_adj_kernel(scale, n_enc_valid):
    def kernel(enc_ref, dec_ref, wq_ref, wk_ref, wv_ref,
               ffw_ref, ffb_ref, ff2w_ref, ff2b_ref, adj_ref):
        enc = enc_ref[...]                       # [Nep, Ep]
        dec = dec_ref[...]                       # [Ndp, Dp]

        # --- single-head scaled cross attention ---
        q = jnp.dot(dec, wq_ref[...], preferred_element_type=jnp.float32)  # [Ndp, Ap]
        k = jnp.dot(enc, wk_ref[...], preferred_element_type=jnp.float32)  # [Nep, Ap]
        v = jnp.dot(enc, wv_ref[...], preferred_element_type=jnp.float32)  # [Nep, Ap]
        # Contract last dim of both operands: feeds the MXU directly, no k.T copy.
        s = jax.lax.dot_general(
            q, k, dimension_numbers=(((1,), (1,)), ((), ())),
            preferred_element_type=jnp.float32) * scale                    # [Ndp, Nep]
        # Mask padded encoder rows (keys) so sublane padding is bit-exact.
        key_idx = jax.lax.broadcasted_iota(jnp.int32, s.shape, 1)
        s = jnp.where(key_idx < n_enc_valid, s, -jnp.inf)

        # softmax over dim=1 (keys); divide via EUP approx reciprocal (~1e-3 drift).
        s_max = jnp.max(s, axis=1, keepdims=True)
        p = jnp.exp(s - s_max)
        denom_inv = pl.reciprocal(jnp.sum(p, axis=1, keepdims=True), approx=True)
        sm = p * denom_inv
        attn = jnp.dot(sm, v, preferred_element_type=jnp.float32)          # [Ndp, Ap]

        # --- FF -> ReLU -> FF2 -> residual with decoder input ---
        h = jnp.dot(attn, ffw_ref[...], preferred_element_type=jnp.float32) + ffb_ref[...]
        h = jnp.maximum(h, 0.0)
        adj = jnp.dot(h, ff2w_ref[...], preferred_element_type=jnp.float32) + ff2b_ref[...]
        adj_ref[...] = adj + dec                                            # [Ndp, Dp]
    return kernel


# ------------------------- Kernel B: lm_head stream ---------------------------

def _lm_head_kernel(adj_ref, lmw_ref, out_ref):
    # adj [Ndp, Dp] resident (same block every step); lm_head weight streamed per
    # vocab tile in bf16; f32 accumulation on the MXU; lane-dense unmasked store.
    out_ref[...] = jnp.dot(adj_ref[...].astype(jnp.bfloat16), lmw_ref[...],
                           preferred_element_type=jnp.float32)


# -------------------------------- Wrapper --------------------------------------

def proposed_model_forward(encoder_x, decoder_x, params, *, vocab_tile=None):
    """ProposedModel.forward. encoder_x:[Ne,E], decoder_x:[Nd,D] -> [Nd, vocab]."""
    Ne, E = encoder_x.shape
    Nd, D = decoder_x.shape
    A = params["WQ"].shape[1]
    V = params["lm_head_w"].shape[1]
    scale = 1.0 / math.sqrt(float(D))            # torch: QKT / sqrt(self.d_dim)

    # Lane/sublane-dense zero padding (exact; padded keys masked in-kernel).
    Ep, Dp, Ap = _round_up(E, LANE), _round_up(D, LANE), _round_up(A, LANE)
    Nep, Ndp = _round_up(Ne, SUBLANE), _round_up(Nd, SUBLANE)

    # Generation-dependent lm_head tiling / VMEM budget.
    vmem_cap = _vmem_capacity_bytes()
    if vmem_cap >= 100 * 1024 * 1024:            # v5e / v6e (128 MiB VMEM)
        tile_cap, vmem_limit = 8192, 96 * 1024 * 1024
    else:                                        # v7x (64 MiB per-TC VMEM)
        tile_cap, vmem_limit = 4096, 48 * 1024 * 1024
    if vocab_tile is not None:
        tile_cap = vocab_tile
    TV, Vp = _pick_vocab_tile(V, tile_cap)

    enc_p = _pad_to(encoder_x, (Nep, Ep))
    dec_p = _pad_to(decoder_x, (Ndp, Dp))
    wq_p = _pad_to(params["WQ"], (Dp, Ap))
    wk_p = _pad_to(params["WK"], (Ep, Ap))
    wv_p = _pad_to(params["WV"], (Ep, Ap))
    ffw_p = _pad_to(params["FF_w"], (Ap, Dp))
    ffb_p = _pad_to(params["FF_b"], (1, Dp))
    ff2w_p = _pad_to(params["FF2_w"], (Dp, Dp))
    ff2b_p = _pad_to(params["FF2_b"], (1, Dp))
    # Stream the dominant lm_head weight in bf16 (halves HBM traffic & tile VMEM).
    lmw_p = _pad_to(params["lm_head_w"], (Dp, Vp)).astype(jnp.bfloat16)

    # --- Kernel A: adjustment branch (tiny; whole arrays resident, no grid) ---
    # TODO(synk): at true GPT2-XL scale (D=A=1600) the resident f32 attention/FF
    #             weights are ~50 MiB; tile this kernel over D if targeting v7x VMEM.
    adj = pl.pallas_call(
        _make_adj_kernel(scale, Ne),
        out_shape=jax.ShapeDtypeStruct((Ndp, Dp), jnp.float32),
        compiler_params=pltpu.CompilerParams(vmem_limit_bytes=vmem_limit),
    )(enc_p, dec_p, wq_p, wk_p, wv_p, ffw_p, ffb_p, ff2w_p, ff2b_p)

    # --- Kernel B: lm_head streamed over vocab tiles; axis is fully independent ---
    logits = pl.pallas_call(
        _lm_head_kernel,
        out_shape=jax.ShapeDtypeStruct((Ndp, Vp), jnp.float32),
        grid=(Vp // TV,),
        in_specs=[
            # adj: constant block index -> loaded once, stays resident (tiny; the
            # default double buffer costs only ~2*Nd*Dp*4 bytes).
            pl.BlockSpec((Ndp, Dp), lambda j: (0, 0)),
            # lm_head weight: vocab-tiled, double-buffered bf16 stream from HBM.
            pl.BlockSpec((Dp, TV), lambda j: (0, j)),
        ],
        out_specs=pl.BlockSpec((Ndp, TV), lambda j: (0, j)),
        compiler_params=pltpu.CompilerParams(
            # No cross-tile dependency anymore -> both v7x TensorCores can split
            # the HBM-bound weight stream.
            dimension_semantics=("parallel",),
            vmem_limit_bytes=vmem_limit,
        ),
    )(adj, lmw_p)

    return logits[:Nd, :V]


def init_params(key, encoder_dim, decoder_dim, attention_dim, vocab):
    e, d, a = encoder_dim, decoder_dim, attention_dim
    ks = jax.random.split(key, 8)
    return {
        # CrossAttentionSingle weights: torch.randn
        "WQ": jax.random.normal(ks[0], (d, a), jnp.float32),
        "WK": jax.random.normal(ks[1], (e, a), jnp.float32),
        "WV": jax.random.normal(ks[2], (e, a), jnp.float32),
        # FF: nn.Linear(a -> d), stored as [in, out] (= torch weight transposed)
        "FF_w": jax.random.uniform(ks[3], (a, d), jnp.float32, -1.0, 1.0) / math.sqrt(a),
        "FF_b": jax.random.uniform(ks[4], (1, d), jnp.float32, -1.0, 1.0) / math.sqrt(a),
        # FF2: nn.Linear(d -> d)
        "FF2_w": jax.random.uniform(ks[5], (d, d), jnp.float32, -1.0, 1.0) / math.sqrt(d),
        "FF2_b": jax.random.uniform(ks[6], (1, d), jnp.float32, -1.0, 1.0) / math.sqrt(d),
        # TODO(synk): GPT2-XL pretrained lm_head replaced with a deterministic synthetic
        #             Linear(d -> vocab, bias=False) weight of matching semantics.
        "lm_head_w": jax.random.normal(ks[7], (d, vocab), jnp.float32) / math.sqrt(d),
    }


if __name__ == "__main__":
    # Small, module-consistent shapes (2-D torch.mm style inputs).
    N_enc, N_dec = 8, 8
    encoder_dim, decoder_dim = 32, 32       # attention_dim = None -> decoder_dim
    attention_dim = decoder_dim
    vocab = 256                             # synthetic stand-in for GPT2-XL's 50257

    key = jax.random.PRNGKey(0)
    k_enc, k_dec, k_par = jax.random.split(key, 3)

    encoder_x = jax.random.normal(k_enc, (N_enc, encoder_dim), jnp.float32)
    decoder_x = jax.random.normal(k_dec, (N_dec, decoder_dim), jnp.float32)
    params = init_params(k_par, encoder_dim, decoder_dim, attention_dim, vocab)

    fwd = jax.jit(proposed_model_forward)
    logits = fwd(encoder_x, decoder_x, params)
    jax.block_until_ready(logits)

    assert logits.shape == (N_dec, vocab), logits.shape
    assert bool(jnp.all(jnp.isfinite(logits)))
    print("KERNEL_OK")
</pallas_src>

<mosaic_0001>
module attributes {stable_mosaic.version = 11 : i64} {
  func.func @_lm_head_kernel(%arg0: i32, %arg1: memref<8x128xf32, #tpu.memory_space<vmem>>, %arg2: memref<128x256xbf16, #tpu.memory_space<vmem>>, %arg3: memref<8x256xf32, #tpu.memory_space<vmem>>) attributes {dimension_semantics = [#tpu.dimension_semantics<parallel>], iteration_bounds = array<i64: 1>, scalar_prefetch = 0 : i64, scratch_operands = 0 : i64, tpu.core_type = #tpu.core_type<tc>, window_params = [{pipeline_mode = #tpu.pipeline_mode<synchronous>, transform_indices = @transform_0, window_bounds = array<i64: 8, 128>}, {transform_indices = @transform_1, window_bounds = array<i64: 128, 256>}, {transform_indices = @transform_2, window_bounds = array<i64: 8, 256>}]} {
    %c0 = arith.constant 0 : index
    %c0_0 = arith.constant 0 : index
    %0 = vector.load %arg1[%c0, %c0_0] : memref<8x128xf32, #tpu.memory_space<vmem>>, vector<8x128xf32>
    %1 = arith.truncf %0 : vector<8x128xf32> to vector<8x128xbf16>
    %c0_1 = arith.constant 0 : index
    %c0_2 = arith.constant 0 : index
    %2 = vector.load %arg2[%c0_1, %c0_2] : memref<128x256xbf16, #tpu.memory_space<vmem>>, vector<128x256xbf16>
    %cst = arith.constant dense<0.000000e+00> : vector<8x256xf32>
    %3 = tpu.matmul %1, %2, %cst {dimension_numbers = #tpu.dot_dimension_numbers<[1], [0], [0], [1], [0, 0, 1, 1], [], []>} : vector<8x128xbf16>, vector<128x256xbf16>, vector<8x256xf32> -> vector<8x256xf32>
    %c0_3 = arith.constant 0 : index
    %c0_4 = arith.constant 0 : index
    %4 = vector.load %arg3[%c0_3, %c0_4] : memref<8x256xf32, #tpu.memory_space<vmem>>, vector<8x256xf32>
    tpu.vector_store %arg3[%c0_3, %c0_4], %3 {strides = array<i32>} : memref<8x256xf32, #tpu.memory_space<vmem>>, vector<8x256xf32>,
    return
  }
  func.func @transform_0(%arg0: i32) -> (i32, i32) {
    %c0_i32 = arith.constant 0 : i32
    %c0_i32_0 = arith.constant 0 : i32
    %c0_i32_1 = arith.constant 0 : i32
    return %c0_i32, %c0_i32_0 : i32, i32
  }
  func.func @transform_1(%arg0: i32) -> (i32, i32) {
    %c0_i32 = arith.constant 0 : i32
    %c0_i32_0 = arith.constant 0 : i32
    return %c0_i32, %arg0 : i32, i32
  }
  func.func @transform_2(%arg0: i32) -> (i32, i32) {
    %c0_i32 = arith.constant 0 : i32
    %c0_i32_0 = arith.constant 0 : i32
    return %c0_i32, %arg0 : i32, i32
  }
}

module attributes {stable_mosaic.version = 11 : i64} {
  func.func @kernel(%arg0: memref<8x128xf32, #tpu.memory_space<vmem>>, %arg1: memref<8x128xf32, #tpu.memory_space<vmem>>, %arg2: memref<128x128xf32, #tpu.memory_space<vmem>>, %arg3: memref<128x128xf32, #tpu.memory_space<vmem>>, %arg4: memref<128x128xf32, #tpu.memory_space<vmem>>, %arg5: memref<128x128xf32, #tpu.memory_space<vmem>>, %arg6: memref<1x128xf32, #tpu.memory_space<vmem>>, %arg7: memref<128x128xf32, #tpu.memory_space<vmem>>, %arg8: memref<1x128xf32, #tpu.memory_space<vmem>>, %arg9: memref<8x128xf32, #tpu.memory_space<vmem>>) attributes {dimension_semantics = [], scalar_prefetch = 0 : i64, scratch_operands = 0 : i64, tpu.core_type = #tpu.core_type<tc>} {
    %c0 = arith.constant 0 : index
    %c0_0 = arith.constant 0 : index
    %0 = vector.load %arg0[%c0, %c0_0] : memref<8x128xf32, #tpu.memory_space<vmem>>, vector<8x128xf32>
    %c0_1 = arith.constant 0 : index
    %c0_2 = arith.constant 0 : index
    %1 = vector.load %arg1[%c0_1, %c0_2] : memref<8x128xf32, #tpu.memory_space<vmem>>, vector<8x128xf32>
    %c0_3 = arith.constant 0 : index
    %c0_4 = arith.constant 0 : index
    %2 = vector.load %arg2[%c0_3, %c0_4] : memref<128x128xf32, #tpu.memory_space<vmem>>, vector<128x128xf32>
    %cst = arith.constant dense<0.000000e+00> : vector<8x128xf32>
    %3 = tpu.matmul %1, %2, %cst {dimension_numbers = #tpu.dot_dimension_numbers<[1], [0], [0], [1], [0, 0, 1, 1], [], []>} : vector<8x128xf32>, vector<128x128xf32>, vector<8x128xf32> -> vector<8x128xf32>
    %c0_5 = arith.constant 0 : index
    %c0_6 = arith.constant 0 : index
    %4 = vector.load %arg3[%c0_5, %c0_6] : memref<128x128xf32, #tpu.memory_space<vmem>>, vector<128x128xf32>
    %cst_7 = arith.constant dense<0.000000e+00> : vector<8x128xf32>
    %5 = tpu.matmul %0, %4, %cst_7 {dimension_numbers = #tpu.dot_dimension_numbers<[1], [0], [0], [1], [0, 0, 1, 1], [], []>} : vector<8x128xf32>, vector<128x128xf32>, vector<8x128xf32> -> vector<8x128xf32>
    %c0_8 = arith.constant 0 : index
    %c0_9 = arith.constant 0 : index
    %6 = vector.load %arg4[%c0_8, %c0_9] : memref<128x128xf32, #tpu.memory_space<vmem>>, vector<128x128xf32>
    %cst_10 = arith.constant dense<0.000000e+00> : vector<8x128xf32>
    %7 = tpu.matmul %0, %6, %cst_10 {dimension_numbers = #tpu.dot_dimension_numbers<[1], [0], [0], [1], [0, 0, 1, 1], [], []>} : vector<8x128xf32>, vector<128x128xf32>, vector<8x128xf32> -> vector<8x128xf32>
    %cst_11 = arith.constant dense<0.000000e+00> : vector<8x8xf32>
    %8 = tpu.matmul %3, %5, %cst_11 {dimension_numbers = #tpu.dot_dimension_numbers<[1], [1], [0], [0], [0, 0, 1, 0], [], []>} : vector<8x128xf32>, vector<8x128xf32>, vector<8x8xf32> -> vector<8x8xf32>
    %cst_12 = arith.constant 0.176776692 : f32
    %9 = vector.broadcast %cst_12 : f32 to vector<8x8xf32>
    %10 = arith.mulf %8, %9 : vector<8x8xf32>
    %11 = tpu.iota {dimensions = array<i32: 1>} : vector<8x8xi32>
    %c8_i32 = arith.constant 8 : i32
    %12 = vector.broadcast %c8_i32 : i32 to vector<8x8xi32>
    %13 = arith.cmpi slt, %11, %12 : vector<8x8xi32>
    %cst_13 = arith.constant 0xFF800000 : f32
    %14 = vector.broadcast %cst_13 : f32 to vector<8x8xf32>
    %15 = arith.select %13, %10, %14 : vector<8x8xi1>, vector<8x8xf32>
    %cst_14 = arith.constant dense<0xFF800000> : vector<8xf32>
    %16 = vector.multi_reduction <maximumf>, %15, %cst_14 [1] : vector<8x8xf32> to vector<8xf32>
    %17 = vector.shape_cast %16 : vector<8xf32> to vector<8x1xf32>
    %18 = vector.broadcast %17 : vector<8x1xf32> to vector<8x8xf32>
    %19 = arith.subf %15, %18 : vector<8x8xf32>
    %20 = math.exp %19 : vector<8x8xf32>
    %cst_15 = arith.constant dense<0.000000e+00> : vector<8xf32>
    %21 = vector.multi_reduction <add>, %20, %cst_15 [1] : vector<8x8xf32> to vector<8xf32>
    %22 = vector.shape_cast %21 : vector<8xf32> to vector<8x1xf32>
    %23 = tpu.reciprocal %22 {approx = true} : vector<8x1xf32> -> vector<8x1xf32>
    %24 = vector.broadcast %23 : vector<8x1xf32> to vector<8x8xf32>
    %25 = arith.mulf %20, %24 : vector<8x8xf32>
    %cst_16 = arith.constant dense<0.000000e+00> : vector<8x128xf32>
    %26 = tpu.matmul %25, %7, %cst_16 {dimension_numbers = #tpu.dot_dimension_numbers<[1], [0], [0], [1], [0, 0, 1, 1], [], []>} : vector<8x8xf32>, vector<8x128xf32>, vector<8x128xf32> -> vector<8x128xf32>
    %c0_17 = arith.constant 0 : index
    %c0_18 = arith.constant 0 : index
    %27 = vector.load %arg5[%c0_17, %c0_18] : memref<128x128xf32, #tpu.memory_space<vmem>>, vector<128x128xf32>
    %cst_19 = arith.constant dense<0.000000e+00> : vector<8x128xf32>
    %28 = tpu.matmul %26, %27, %cst_19 {dimension_numbers = #tpu.dot_dimension_numbers<[1], [0], [0], [1], [0, 0, 1, 1], [], []>} : vector<8x128xf32>, vector<128x128xf32>, vector<8x128xf32> -> vector<8x128xf32>
    %c0_20 = arith.constant 0 : index
    %c0_21 = arith.constant 0 : index
    %29 = vector.load %arg6[%c0_20, %c0_21] : memref<1x128xf32, #tpu.memory_space<vmem>>, vector<1x128xf32>
    %30 = vector.broadcast %29 : vector<1x128xf32> to vector<8x128xf32>
    %31 = arith.addf %28, %30 : vector<8x128xf32>
    %cst_22 = arith.constant 0.000000e+00 : f32
    %32 = vector.broadcast %cst_22 : f32 to vector<8x128xf32>
    %33 = arith.maximumf %31, %32 : vector<8x128xf32>
    %c0_23 = arith.constant 0 : index
    %c0_24 = arith.constant 0 : index
    %34 = vector.load %arg7[%c0_23, %c0_24] : memref<128x128xf32, #tpu.memory_space<vmem>>, vector<128x128xf32>
    %cst_25 = arith.constant dense<0.000000e+00> : vector<8x128xf32>
    %35 = tpu.matmul %33, %34, %cst_25 {dimension_numbers = #tpu.dot_dimension_numbers<[1], [0], [0], [1], [0, 0, 1, 1], [], []>} : vector<8x128xf32>, vector<128x128xf32>, vector<8x128xf32> -> vector<8x128xf32>
    %c0_26 = arith.constant 0 : index
    %c0_27 = arith.constant 0 : index
    %36 = vector.load %arg8[%c0_26, %c0_27] : memref<1x128xf32, #tpu.memory_space<vmem>>, vector<1x128xf32>
    %37 = vector.broadcast %36 : vector<1x128xf32> to vector<8x128xf32>
    %38 = arith.addf %35, %37 : vector<8x128xf32>
    %39 = arith.addf %38, %1 : vector<8x128xf32>
    %c0_28 = arith.constant 0 : index
    %c0_29 = arith.constant 0 : index
    %40 = vector.load %arg9[%c0_28, %c0_29] : memref<8x128xf32, #tpu.memory_space<vmem>>, vector<8x128xf32>
    tpu.vector_store %arg9[%c0_28, %c0_29], %39 {strides = array<i32>} : memref<8x128xf32, #tpu.memory_space<vmem>>, vector<8x128xf32>,
    return
  }
}

</mosaic_0001>

<bundles_post_ra>
// kernel: proposed_model_forward.3
= control target key start
LH: loop header
LB: loop body
LE: loop exit
PB: predicated region body
PF: predicated region fallthrough
CT: control target
= control target key end

     0   :  { %v232_v2 = vmov 0   ;;  %s303_s0 = inlined_call_operand.vmem [shape: f32[8,128], index: 0, kind: input, shape index: {}]   ;;  %s304_s1 = inlined_call_operand.vmem [shape: bf16[128,256], index: 1, kind: input, shape index: {}]   ;;  %s305_s2 = inlined_call_operand.hbm [shape: f32[8,256], index: 2, kind: output, shape index: {}]  }
   0x1   :  { %v186_v0 = vld [vmem:[%s304_s1 + $0x74] ss:$8 sps:$4 sm:$0xff]   ;;  %v188_v1 = vld [vmem:[%s304_s1 + $0x70] ss:$8 sps:$4 sm:$0xff]   ;;  %143 = vmatprep.mubr.bf16.mxu0 %v232_v2  ;;  %v189_v3 = vld [vmem:[%s304_s1 + $0x64] ss:$8 sps:$4 sm:$0xff]  }
   0x2   :  { %111 = vmatprep.subr.bf16.mxu0 %v186_v0  ;;  %v191_v4 = vld [vmem:[%s304_s1 + $0x60] ss:$8 sps:$4 sm:$0xff]   ;;  %v192_v5 = vld [vmem:[%s304_s1 + $0x54] ss:$8 sps:$4 sm:$0xff]   ;;  %v194_v6 = vld [vmem:[%s304_s1 + $0x50] ss:$8 sps:$4 sm:$0xff]  }
   0x3   :  { %112 = vmatpush1.bf16.msra.mxu0 %v188_v1  ;;  %v195_v7 = vld [vmem:[%s304_s1 + $0x44] ss:$8 sps:$4 sm:$0xff]   ;;  %v197_v8 = vld [vmem:[%s304_s1 + $0x40] ss:$8 sps:$4 sm:$0xff]  }
   0x4   :  { %113 = vmatprep.subr.bf16.mxu0 %v189_v3 }
   0x7   :  { %114 = vmatpush1.bf16.msra.mxu0 %v191_v4 }
   0x8   :  { %115 = vmatprep.subr.bf16.mxu0 %v192_v5 }
   0xb   :  { %116 = vmatpush1.bf16.msra.mxu0 %v194_v6 }
   0xc   :  { %7 = vsyncpa [#allocation3], 0  ;;  %117 = vmatprep.subr.bf16.mxu0 %v195_v7  ;;  %v198_v9 = vld [vmem:[%s304_s1 + $0x34] ss:$8 sps:$4 sm:$0xff]   ;;  %v200_v10 = vld [vmem:[%s304_s1 + $0x30] ss:$8 sps:$4 sm:$0xff]  }
   0xd   :  { %v201_v11 = vld [vmem:[%s304_s1 + $0x24] ss:$8 sps:$4 sm:$0xff]   ;;  %v203_v12 = vld [vmem:[%s304_s1 + $0x20] ss:$8 sps:$4 sm:$0xff]   ;;  %v204_v13 = vld [vmem:[%s304_s1 + $0x14] ss:$8 sps:$4 sm:$0xff]  }
   0xe   :  { %v206_v14 = vld [vmem:[%s304_s1 + $0x10] ss:$8 sps:$4 sm:$0xff]   ;;  %v207_v15 = vld [vmem:[%s304_s1 + $0x4] ss:$8 sps:$4 sm:$0xff]   ;;  %v209_v16 = vld [vmem:[%s304_s1] ss:$8 sps:$4 sm:$0xff]  }
   0xf   :  { %118 = vmatpush1.bf16.msra.mxu0 %v197_v8  ;;  %v13_v17 = vld [vmem:[%s303_s0] sm:$0xff]  ;;  %s233_s15 = smov [#allocation2]  }
  0x10   :  { %119 = vmatprep.subr.bf16.mxu0 %v198_v9  ;;  %v14_v18 = vpack.c.bf16 %v13_v17, %v13_v17  ;;  %s160_s16 = sshll.u32 %s233_s15, 4  ;;  %s161_s16 = int_to_ptr.vmem [resolvable:$true] %s160_s16 }
  0x11   :  { %s210_s17 = scalar_lea.vmem %s161_s16, 256  ;;  %p215_p1 = scmp.lt.s32.totalorder %s161_s16, %s161_s16 }
  0x12   :  { %p211_p0 = scmp.ne.s32.totalorder %s161_s16, %s210_s17  ;;  %p216_p2 = scmp.lt.s32.totalorder %s210_s17, %s210_s17 }
  0x13   :  { %120 = vmatpush1.bf16.msra.mxu0 %v200_v10 }
  0x14   :  { %121 = vmatprep.subr.bf16.mxu0 %v201_v11  ;;  %p217_p3 = por %p216_p2, %p215_p1 }
  0x16   :  { %p218_p4 = pnand %p217_p3, %p211_p0 }
  0x17   :  { %122 = vmatpush1.bf16.msra.mxu0 %v203_v12 }
  0x18   :  { %123 = vmatprep.subr.bf16.mxu0 %v204_v13 }
  0x1b   :  { %124 = vmatpush1.bf16.msra.mxu0 %v206_v14 }
  0x1c   :  { %125 = vmatprep.subr.bf16.mxu0 %v207_v15 }
  0x1f   :  { %126 = vmatpush1.bf16.msra.mxu0 %v209_v16 }
  0x22   :  { %144 = vmatmul.mubr.bf16.vlgmr.msra.gmra.mxu0 %v14_v18 }
  0xe2   :  { %v145_v19 = vpop.f32.mrf.mxu0 }
  0xe3   :  { %152 = vst [vmem:[#allocation2] sm:$0xff] %v145_v19 }
  0xe4   :  { %v147_v20 = vpop.f32.mrf.mxu0 }
  0xe5   :  { %153 = vst [vmem:[#allocation2 + $0x8] sm:$0xff] %v147_v20 }
  0xe6   :  { %v149_v21 = vpop.f32.mrf.mxu0 }
  0xe7   :  { %221 = shalt.err (!%p218_p4)
}
  0xe8   :  { %163 = dma.vmem_to_hbm [thread:$0]  %s161_s16, 256, %s305_s2, [#allocation3]   ;;  %v150_v22 = vpop.f32.mrf.mxu0 }
  0xe9   :  { %230 = dma.done.wait [#allocation3], 256  }
  0xea   :  { %231 = vsyncadd [#allocation3], 4294967040 }
  0xeb   :  { %167 = vsyncpa [#allocation3], 1 }

// kernel: proposed_model_forward.2
= control target key start
LH: loop header
LB: loop body
LE: loop exit
PB: predicated region body
PF: predicated region fallthrough
CT: control target
= control target key end

     0   :  { %v928_v0 = vmov 0.0   ;;  %vm929_vm0 = vmmov 0   ;;  %v363_v55 = vlaneseq  ;;  %vm367_vm2 = vcmask 64512   ;;  %s1342_s3 = inlined_call_operand.vmem [shape: f32[128,128], index: 3, kind: input, shape index: {}]   ;;  %s1343_s2 = inlined_call_operand.vmem [shape: f32[128,128], index: 2, kind: input, shape index: {}]   ;;  %s1344_s0 = inlined_call_operand.vmem [shape: f32[8,128], index: 0, kind: input, shape index: {}]   ;;  %s1345_s1 = inlined_call_operand.vmem [shape: f32[8,128], index: 1, kind: input, shape index: {}]   ;;  %s1346_s4 = inlined_call_operand.vmem [shape: f32[128,128], index: 4, kind: input, shape index: {}]   ;;  %s1347_s5 = inlined_call_operand.vmem [shape: f32[128,128], index: 5, kind: input, shape index: {}]   ;;  %s1348_s7 = inlined_call_operand.vmem [shape: f32[128,128], index: 7, kind: input, shape index: {}]   ;;  %s1349_s6 = inlined_call_operand.vmem [shape: f32[1,128], index: 6, kind: input, shape index: {}]   ;;  %s1350_s8 = inlined_call_operand.vmem [shape: f32[1,128], index: 8, kind: input, shape index: {}]   ;;  %s1351_s9 = inlined_call_operand.vmem [shape: f32[8,128], index: 9, kind: output, shape index: {}]  }
   0x1   :  { %772 = vmatprep.subr.mxu1 %v928_v0  ;;  %v135_v1 = vld [vmem:[%s1342_s3 + $0x78] sm:$0xff]  ;;  %737 = vmatprep.subr.mxu0 %v928_v0  ;;  %v134_v3 = vld [vmem:[%s1342_s3 + $0x70] sm:$0xff]  ;;  %v133_v5 = vld [vmem:[%s1342_s3 + $0x68] sm:$0xff] }
   0x2   :  { %v49_v2 = vld [vmem:[%s1343_s2 + $0x78] sm:$0xff]  ;;  %773 = vmatpush3.msra.mxu1 %v135_v1  ;;  %v48_v4 = vld [vmem:[%s1343_s2 + $0x70] sm:$0xff]  ;;  %v47_v6 = vld [vmem:[%s1343_s2 + $0x68] sm:$0xff]  ;;  %804 = vmatprep.mubr.msk.f32.mxu1 %vm929_vm0, %v928_v0  ;;  %v364_v56 = vand.u32 127, %v363_v55 }
   0x3   :  { %738 = vmatpush3.msra.mxu0 %v49_v2  ;;  %774 = vmatprep.subr.mxu1 %v928_v0  ;;  %v132_v7 = vld [vmem:[%s1342_s3 + $0x60] sm:$0xff]  ;;  %v131_v9 = vld [vmem:[%s1342_s3 + $0x58] sm:$0xff]  ;;  %v130_v11 = vld [vmem:[%s1342_s3 + $0x50] sm:$0xff] }
   0x4   :  { %739 = vmatprep.subr.mxu0 %v928_v0  ;;  %775 = vmatpush3.msra.mxu1 %v134_v3  ;;  %v46_v8 = vld [vmem:[%s1343_s2 + $0x60] sm:$0xff]  ;;  %v45_v10 = vld [vmem:[%s1343_s2 + $0x58] sm:$0xff]  ;;  %v44_v12 = vld [vmem:[%s1343_s2 + $0x50] sm:$0xff]  ;;  %vm365_vm1 = vcmp.lt.s32.totalorder %v364_v56, 8 }
   0x5   :  { %740 = vmatpush3.msra.mxu0 %v48_v4  ;;  %776 = vmatprep.subr.mxu1 %v928_v0  ;;  %v129_v13 = vld [vmem:[%s1342_s3 + $0x48] sm:$0xff]  ;;  %v128_v15 = vld [vmem:[%s1342_s3 + $0x40] sm:$0xff]  ;;  %v127_v17 = vld [vmem:[%s1342_s3 + $0x38] sm:$0xff] }
   0x6   :  { %741 = vmatprep.subr.mxu0 %v928_v0  ;;  %777 = vmatpush3.msra.mxu1 %v133_v5  ;;  %v43_v14 = vld [vmem:[%s1343_s2 + $0x48] sm:$0xff]  ;;  %v42_v16 = vld [vmem:[%s1343_s2 + $0x40] sm:$0xff]  ;;  %v41_v18 = vld [vmem:[%s1343_s2 + $0x38] sm:$0xff] }
   0x7   :  { %742 = vmatpush3.msra.mxu0 %v47_v6  ;;  %778 = vmatprep.subr.mxu1 %v928_v0  ;;  %v126_v19 = vld [vmem:[%s1342_s3 + $0x30] sm:$0xff]  ;;  %v125_v21 = vld [vmem:[%s1342_s3 + $0x28] sm:$0xff]  ;;  %v124_v23 = vld [vmem:[%s1342_s3 + $0x20] sm:$0xff] }
   0x8   :  { %743 = vmatprep.subr.mxu0 %v928_v0  ;;  %779 = vmatpush3.msra.mxu1 %v132_v7  ;;  %v40_v20 = vld [vmem:[%s1343_s2 + $0x30] sm:$0xff]  ;;  %v39_v22 = vld [vmem:[%s1343_s2 + $0x28] sm:$0xff]  ;;  %v38_v24 = vld [vmem:[%s1343_s2 + $0x20] sm:$0xff] }
   0x9   :  { %744 = vmatpush3.msra.mxu0 %v46_v8  ;;  %780 = vmatprep.subr.mxu1 %v928_v0  ;;  %v123_v25 = vld [vmem:[%s1342_s3 + $0x18] sm:$0xff]  ;;  %v122_v27 = vld [vmem:[%s1342_s3 + $0x10] sm:$0xff]  ;;  %v121_v29 = vld [vmem:[%s1342_s3 + $0x8] sm:$0xff] }
   0xa   :  { %745 = vmatprep.subr.mxu0 %v928_v0  ;;  %781 = vmatpush3.msra.mxu1 %v131_v9  ;;  %v37_v26 = vld [vmem:[%s1343_s2 + $0x18] sm:$0xff]  ;;  %v36_v28 = vld [vmem:[%s1343_s2 + $0x10] sm:$0xff]  ;;  %v35_v30 = vld [vmem:[%s1343_s2 + $0x8] sm:$0xff] }
   0xb   :  { %746 = vmatpush3.msra.mxu0 %v45_v10  ;;  %782 = vmatprep.subr.mxu1 %v928_v0  ;;  %v120_v31 = vld [vmem:[%s1342_s3] sm:$0xff]  ;;  %v221_v39 = vld [vmem:[%s1346_s4 + $0x78] sm:$0xff]  ;;  %v220_v40 = vld [vmem:[%s1346_s4 + $0x70] sm:$0xff] }
   0xc   :  { %747 = vmatprep.subr.mxu0 %v928_v0  ;;  %783 = vmatpush3.msra.mxu1 %v130_v11  ;;  %v1106_v32 = vld [vmem:[%s1344_s0] sm:$0xff]  ;;  %v219_v41 = vld [vmem:[%s1346_s4 + $0x68] sm:$0xff]  ;;  %v217_v43 = vld [vmem:[%s1346_s4 + $0x58] sm:$0xff] }
   0xd   :  { %748 = vmatpush3.msra.mxu0 %v44_v12  ;;  %784 = vmatprep.subr.mxu1 %v928_v0  ;;  %v34_v33 = vld [vmem:[%s1343_s2] sm:$0xff]  ;;  %v216_v44 = vld [vmem:[%s1346_s4 + $0x50] sm:$0xff]  ;;  %v215_v45 = vld [vmem:[%s1346_s4 + $0x48] sm:$0xff] }
   0xe   :  { %749 = vmatprep.subr.mxu0 %v928_v0  ;;  %785 = vmatpush3.msra.mxu1 %v129_v13  ;;  %v1118_v34 = vld [vmem:[%s1345_s1] sm:$0xff]  ;;  %v213_v47 = vld [vmem:[%s1346_s4 + $0x38] sm:$0xff]  ;;  %v212_v48 = vld [vmem:[%s1346_s4 + $0x30] sm:$0xff] }
   0xf   :  { %750 = vmatpush3.msra.mxu0 %v43_v14  ;;  %786 = vmatprep.subr.mxu1 %v928_v0  ;;  %v218_v42 = vld [vmem:[%s1346_s4 + $0x60] sm:$0xff]  ;;  %v211_v49 = vld [vmem:[%s1346_s4 + $0x28] sm:$0xff]  ;;  %v209_v51 = vld [vmem:[%s1346_s4 + $0x18] sm:$0xff] }
  0x10   :  { %751 = vmatprep.subr.mxu0 %v928_v0  ;;  %787 = vmatpush3.msra.mxu1 %v128_v15  ;;  %v214_v46 = vld [vmem:[%s1346_s4 + $0x40] sm:$0xff]  ;;  %v208_v52 = vld [vmem:[%s1346_s4 + $0x10] sm:$0xff]  ;;  %v207_v53 = vld [vmem:[%s1346_s4 + $0x8] sm:$0xff] }
  0x11   :  { %752 = vmatpush3.msra.mxu0 %v42_v16  ;;  %788 = vmatprep.subr.mxu1 %v928_v0  ;;  %v210_v50 = vld [vmem:[%s1346_s4 + $0x20] sm:$0xff]  ;;  %v467_v9 = vld [vmem:[%s1347_s5 + $0x78] sm:$0xff]  ;;  %v466_v10 = vld [vmem:[%s1347_s5 + $0x70] sm:$0xff] }
  0x12   :  { %753 = vmatprep.subr.mxu0 %v928_v0  ;;  %789 = vmatpush3.msra.mxu1 %v127_v17  ;;  %v206_v54 = vld [vmem:[%s1346_s4] sm:$0xff]  ;;  %v465_v11 = vld [vmem:[%s1347_s5 + $0x68] sm:$0xff]  ;;  %v463_v13 = vld [vmem:[%s1347_s5 + $0x58] sm:$0xff] }
  0x13   :  { %754 = vmatpush3.msra.mxu0 %v41_v18  ;;  %790 = vmatprep.subr.mxu1 %v928_v0  ;;  %v464_v12 = vld [vmem:[%s1347_s5 + $0x60] sm:$0xff]  ;;  %v462_v14 = vld [vmem:[%s1347_s5 + $0x50] sm:$0xff]  ;;  %v461_v15 = vld [vmem:[%s1347_s5 + $0x48] sm:$0xff] }
  0x14   :  { %755 = vmatprep.subr.mxu0 %v928_v0  ;;  %791 = vmatpush3.msra.mxu1 %v126_v19  ;;  %v460_v16 = vld [vmem:[%s1347_s5 + $0x40] sm:$0xff]  ;;  %v459_v17 = vld [vmem:[%s1347_s5 + $0x38] sm:$0xff]  ;;  %v458_v18 = vld [vmem:[%s1347_s5 + $0x30] sm:$0xff] }
  0x15   :  { %756 = vmatpush3.msra.mxu0 %v40_v20  ;;  %792 = vmatprep.subr.mxu1 %v928_v0  ;;  %v457_v19 = vld [vmem:[%s1347_s5 + $0x28] sm:$0xff]  ;;  %v456_v20 = vld [vmem:[%s1347_s5 + $0x20] sm:$0xff] }
  0x16   :  { %757 = vmatprep.subr.mxu0 %v928_v0  ;;  %793 = vmatpush3.msra.mxu1 %v125_v21  ;;  %v455_v21 = vld [vmem:[%s1347_s5 + $0x18] sm:$0xff] }
  0x17   :  { %758 = vmatpush3.msra.mxu0 %v39_v22  ;;  %794 = vmatprep.subr.mxu1 %v928_v0  ;;  %v454_v22 = vld [vmem:[%s1347_s5 + $0x10] sm:$0xff] }
  0x18   :  { %759 = vmatprep.subr.mxu0 %v928_v0  ;;  %795 = vmatpush3.msra.mxu1 %v124_v23  ;;  %v453_v23 = vld [vmem:[%s1347_s5 + $0x8] sm:$0xff] }
  0x19   :  { %760 = vmatpush3.msra.mxu0 %v38_v24  ;;  %796 = vmatprep.subr.mxu1 %v928_v0  ;;  %v452_v24 = vld [vmem:[%s1347_s5] sm:$0xff] }
  0x1a   :  { %761 = vmatprep.subr.mxu0 %v928_v0  ;;  %797 = vmatpush3.msra.mxu1 %v123_v25  ;;  %v561_v25 = vld [vmem:[%s1348_s7 + $0x78] sm:$0xff] }
  0x1b   :  { %762 = vmatpush3.msra.mxu0 %v37_v26  ;;  %798 = vmatprep.subr.mxu1 %v928_v0  ;;  %v560_v26 = vld [vmem:[%s1348_s7 + $0x70] sm:$0xff] }
  0x1c   :  { %763 = vmatprep.subr.mxu0 %v928_v0  ;;  %799 = vmatpush3.msra.mxu1 %v122_v27  ;;  %v559_v27 = vld [vmem:[%s1348_s7 + $0x68] sm:$0xff] }
  0x1d   :  { %764 = vmatpush3.msra.mxu0 %v36_v28  ;;  %800 = vmatprep.subr.mxu1 %v928_v0  ;;  %v558_v28 = vld [vmem:[%s1348_s7 + $0x60] sm:$0xff] }
  0x1e   :  { %765 = vmatprep.subr.mxu0 %v928_v0  ;;  %801 = vmatpush3.msra.mxu1 %v121_v29  ;;  %v557_v29 = vld [vmem:[%s1348_s7 + $0x58] sm:$0xff] }
  0x1f   :  { %766 = vmatpush3.msra.mxu0 %v35_v30  ;;  %802 = vmatprep.subr.mxu1 %v928_v0  ;;  %v556_v30 = vld [vmem:[%s1348_s7 + $0x50] sm:$0xff] }
  0x20   :  { %803 = vmatpush3.msra.mxu1 %v120_v31  ;;  %767 = vmatprep.subr.mxu0 %v928_v0  ;;  %v555_v31 = vld [vmem:[%s1348_s7 + $0x48] sm:$0xff] }
  0x21   :  { %805 = vmatmul.mubr.f32.vlgmr.msra.gmra.mxu1 %v1106_v32  ;;  %768 = vmatpush3.msra.mxu0 %v34_v33  ;;  %v553_v33 = vld [vmem:[%s1348_s7 + $0x38] sm:$0xff] }
  0x22   :  { %769 = vmatprep.mubr.msk.f32.mxu0 %vm929_vm0, %v928_v0  ;;  %842 = vmatprep.subr.mxu1 %v928_v0 }
  0x23   :  { %770 = vmatmul.mubr.f32.vlgmr.msra.gmra.mxu0 %v1118_v34  ;;  %844 = vmatprep.mubr.msk.f32.mxu1 %vm929_vm0, %v928_v0 }
  0x24   :  { %807 = vmatprep.subr.mxu0 %v928_v0  ;;  %839 = vmatprep.mubr.msk.f32.mxu0 %vm929_vm0, %v928_v0 }
  0x25   :  { %808 = vmatpush3.msra.mxu0 %v221_v39 }
  0x26   :  { %809 = vmatprep.subr.mxu0 %v928_v0 }
  0x27   :  { %810 = vmatpush3.msra.mxu0 %v220_v40 }
  0x28   :  { %811 = vmatprep.subr.mxu0 %v928_v0 }
  0x29   :  { %812 = vmatpush3.msra.mxu0 %v219_v41  ;;  %v548_v41 = vld [vmem:[%s1348_s7 + $0x10] sm:$0xff] }
  0x2a   :  { %813 = vmatprep.subr.mxu0 %v928_v0 }
  0x2b   :  { %814 = vmatpush3.msra.mxu0 %v218_v42  ;;  %v547_v42 = vld [vmem:[%s1348_s7 + $0x8] sm:$0xff] }
  0x2c   :  { %815 = vmatprep.subr.mxu0 %v928_v0 }
  0x2d   :  { %816 = vmatpush3.msra.mxu0 %v217_v43  ;;  %v546_v43 = vld [vmem:[%s1348_s7] sm:$0xff] }
  0x2e   :  { %817 = vmatprep.subr.mxu0 %v928_v0 }
  0x2f   :  { %818 = vmatpush3.msra.mxu0 %v216_v44  ;;  %v646_v44 = vld [vmem:[%s1349_s6] ss:$0 sm:$0xff] }
  0x30   :  { %819 = vmatprep.subr.mxu0 %v928_v0 }
  0x31   :  { %820 = vmatpush3.msra.mxu0 %v215_v45 }
  0x32   :  { %821 = vmatprep.subr.mxu0 %v928_v0 }
  0x33   :  { %822 = vmatpush3.msra.mxu0 %v214_v46 }
  0x34   :  { %823 = vmatprep.subr.mxu0 %v928_v0 }
  0x35   :  { %824 = vmatpush3.msra.mxu0 %v213_v47 }
  0x36   :  { %825 = vmatprep.subr.mxu0 %v928_v0 }
  0x37   :  { %826 = vmatpush3.msra.mxu0 %v212_v48 }
  0x38   :  { %827 = vmatprep.subr.mxu0 %v928_v0 }
  0x39   :  { %828 = vmatpush3.msra.mxu0 %v211_v49  ;;  %v647_v49 = vld [vmem:[%s1350_s8] ss:$0 sm:$0xff] }
  0x3a   :  { %829 = vmatprep.subr.mxu0 %v928_v0 }
  0x3b   :  { %830 = vmatpush3.msra.mxu0 %v210_v50 }
  0x3c   :  { %831 = vmatprep.subr.mxu0 %v928_v0 }
  0x3d   :  { %832 = vmatpush3.msra.mxu0 %v209_v51 }
  0x3e   :  { %833 = vmatprep.subr.mxu0 %v928_v0 }
  0x3f   :  { %834 = vmatpush3.msra.mxu0 %v208_v52 }
  0x40   :  { %835 = vmatprep.subr.mxu0 %v928_v0 }
  0x41   :  { %836 = vmatpush3.msra.mxu0 %v207_v53 }
  0x42   :  { %837 = vmatprep.subr.mxu0 %v928_v0 }
  0x43   :  { %838 = vmatpush3.msra.mxu0 %v206_v54 }
  0x44   :  { %840 = vmatmul.mubr.f32.vlgmr.msra.gmra.mxu0 %v1106_v32  ;;  %887 = vmatprep.subr.mxu0 %v928_v0  ;;  %v554_v32 = vld [vmem:[%s1348_s7 + $0x40] sm:$0xff] }
  0x45   :  { %919 = vmatprep.mubr.msk.f32.mxu0 %vm929_vm0, %v928_v0  ;;  %888 = vmatpush3.msra.mxu0 %v561_v25 }
  0x46   :  { %889 = vmatprep.subr.mxu0 %v928_v0 }
  0x47   :  { %890 = vmatpush3.msra.mxu0 %v560_v26 }
  0x48   :  { %891 = vmatprep.subr.mxu0 %v928_v0 }
  0x49   :  { %892 = vmatpush3.msra.mxu0 %v559_v27 }
  0x4a   :  { %893 = vmatprep.subr.mxu0 %v928_v0 }
  0x4b   :  { %894 = vmatpush3.msra.mxu0 %v558_v28 }
  0x4c   :  { %895 = vmatprep.subr.mxu0 %v928_v0 }
  0x4d   :  { %896 = vmatpush3.msra.mxu0 %v557_v29 }
  0x4e   :  { %897 = vmatprep.subr.mxu0 %v928_v0 }
  0x4f   :  { %898 = vmatpush3.msra.mxu0 %v556_v30 }
  0x50   :  { %899 = vmatprep.subr.mxu0 %v928_v0 }
  0x51   :  { %900 = vmatpush3.msra.mxu0 %v555_v31 }
  0x52   :  { %901 = vmatprep.subr.mxu0 %v928_v0 }
  0x53   :  { %902 = vmatpush3.msra.mxu0 %v554_v32 }
  0x54   :  { %903 = vmatprep.subr.mxu0 %v928_v0 }
  0x55   :  { %904 = vmatpush3.msra.mxu0 %v553_v33 }
  0x56   :  { %905 = vmatprep.subr.mxu0 %v928_v0 }
  0xe1   :  { %v202_v35 = vpop.f32.mrf.mxu1 }
  0xe2   :  { %843 = vmatpush3.xpose.msra.mxu1 %v202_v35  ;;  %v552_v35 = vld [vmem:[%s1348_s7 + $0x30] sm:$0xff] }
  0xe3   :  { %v116_v36 = vpop.f32.mrf.mxu0  ;;  %v806_v37 = vpop.f32.mrf.mxu1  ;;  %847 = vmatprep.subr.mxu1 %v928_v0  ;;  %906 = vmatpush3.msra.mxu0 %v552_v35 }
  0xe4   :  { %907 = vmatprep.subr.mxu0 %v928_v0  ;;  %v550_v37 = vld [vmem:[%s1348_s7 + $0x20] sm:$0xff] }
  0xe5   :  { %v771_v38 = vpop.f32.mrf.mxu0  ;;  %845 = vmatmul.mubr.f32.vlgmr.msra.gmra.mxu1 %v116_v36  ;;  %v551_v36 = vld [vmem:[%s1348_s7 + $0x28] sm:$0xff] }
  0xe6   :  { %849 = vmatprep.mubr.msk.f32.mxu1 %vm929_vm0, %v928_v0  ;;  %908 = vmatpush3.msra.mxu0 %v551_v36  ;;  %v549_v38 = vld [vmem:[%s1348_s7 + $0x18] sm:$0xff] }
  0xe7   :  { %909 = vmatprep.subr.mxu0 %v928_v0 }
  0xe8   :  { %910 = vmatpush3.msra.mxu0 %v550_v37 }
  0xe9   :  { %911 = vmatprep.subr.mxu0 %v928_v0 }
  0xea   :  { %912 = vmatpush3.msra.mxu0 %v549_v38 }
  0xeb   :  { %913 = vmatprep.subr.mxu0 %v928_v0 }
  0xec   :  { %914 = vmatpush3.msra.mxu0 %v548_v41 }
  0xed   :  { %915 = vmatprep.subr.mxu0 %v928_v0 }
  0xee   :  { %916 = vmatpush3.msra.mxu0 %v547_v42 }
  0xef   :  { %917 = vmatprep.subr.mxu0 %v928_v0 }
  0xf0   :  { %918 = vmatpush3.msra.mxu0 %v546_v43 }
 0x104   :  { %v288_v4 = vpop.f32.mrf.mxu0 }
 0x105   :  { %848 = vmatpush3.msra.mxu1 %v288_v4 }
 0x106   :  { %v841_v5 = vpop.f32.mrf.mxu0  ;;  %852 = vmatprep.subr.mxu1 %v928_v0 }
 0x1a5   :  { %v358_v57 = vpop.f32.mrf.mxu1 }
 0x1a6   :  { %v362_v58 = vmul.f32 0.17677669, %v358_v57 }
 0x1a7   :  { %v846_v59 = vpop.f32.mrf.mxu1 }
 0x1a8   :  { %v366_v60 = vsel %vm365_vm1, %v362_v58, -inf }
 0x1a9   :  { %v368_v61 = vsel %vm367_vm2, %v366_v60, -inf }
 0x1aa   :  { %369 = vmax.xlane.f32.xlu0 %v368_v61 }
 0x233   :  { %v370_v62 = vpop.xlane.xlu0 %369 }
 0x234   :  { %v371_v63 = vsub.f32 %v366_v60, %v370_v62 }
 0x236   :  { %v372_v1 = vmul.f32 1.442695, %v371_v63 }
 0x238   :  { %924 = vpow2.f32 %v372_v1 }
 0x245   :  { %v925_v2 = vpop.eup %924 }
 0x246   :  { %v374_v3 = vsel %vm367_vm2, %v925_v2, 0.0 }
 0x247   :  { %375 = vadd.xlane.f32.xlu0 %v374_v3 }
 0x2d0   :  { %v376_v6 = vpop.xlane.xlu0 %375 }
 0x2d1   :  { %926 = vrcp.f32 %v376_v6 }
 0x2de   :  { %v927_v7 = vpop.eup %926 }
 0x2df   :  { %v378_v8 = vmul.f32 %v927_v7, %v925_v2 }
 0x2e1   :  { %850 = vmatmul.mubr.msk.f32.vlgmr.msra.gmra.mxu1 %vm367_vm2, %v378_v8 }
 0x2e2   :  { %853 = vmatpush3.msra.mxu1 %v467_v9  ;;  %884 = vmatprep.mubr.msk.f32.mxu1 %vm929_vm0, %v928_v0 }
 0x2e3   :  { %854 = vmatprep.subr.mxu1 %v928_v0 }
 0x2e4   :  { %855 = vmatpush3.msra.mxu1 %v466_v10 }
 0x2e5   :  { %856 = vmatprep.subr.mxu1 %v928_v0 }
 0x2e6   :  { %857 = vmatpush3.msra.mxu1 %v465_v11 }
 0x2e7   :  { %858 = vmatprep.subr.mxu1 %v928_v0 }
 0x2e8   :  { %859 = vmatpush3.msra.mxu1 %v464_v12 }
 0x2e9   :  { %860 = vmatprep.subr.mxu1 %v928_v0 }
 0x2ea   :  { %861 = vmatpush3.msra.mxu1 %v463_v13 }
 0x2eb   :  { %862 = vmatprep.subr.mxu1 %v928_v0 }
 0x2ec   :  { %863 = vmatpush3.msra.mxu1 %v462_v14 }
 0x2ed   :  { %864 = vmatprep.subr.mxu1 %v928_v0 }
 0x2ee   :  { %865 = vmatpush3.msra.mxu1 %v461_v15 }
 0x2ef   :  { %866 = vmatprep.subr.mxu1 %v928_v0 }
 0x2f0   :  { %867 = vmatpush3.msra.mxu1 %v460_v16 }
 0x2f1   :  { %868 = vmatprep.subr.mxu1 %v928_v0 }
 0x2f2   :  { %869 = vmatpush3.msra.mxu1 %v459_v17 }
 0x2f3   :  { %870 = vmatprep.subr.mxu1 %v928_v0 }
 0x2f4   :  { %871 = vmatpush3.msra.mxu1 %v458_v18 }
 0x2f5   :  { %872 = vmatprep.subr.mxu1 %v928_v0 }
 0x2f6   :  { %873 = vmatpush3.msra.mxu1 %v457_v19 }
 0x2f7   :  { %874 = vmatprep.subr.mxu1 %v928_v0 }
 0x2f8   :  { %875 = vmatpush3.msra.mxu1 %v456_v20 }
 0x2f9   :  { %876 = vmatprep.subr.mxu1 %v928_v0 }
 0x2fa   :  { %877 = vmatpush3.msra.mxu1 %v455_v21 }
 0x2fb   :  { %878 = vmatprep.subr.mxu1 %v928_v0 }
 0x2fc   :  { %879 = vmatpush3.msra.mxu1 %v454_v22 }
 0x2fd   :  { %880 = vmatprep.subr.mxu1 %v928_v0 }
 0x2fe   :  { %881 = vmatpush3.msra.mxu1 %v453_v23 }
 0x2ff   :  { %882 = vmatprep.subr.mxu1 %v928_v0 }
 0x300   :  { %883 = vmatpush3.msra.mxu1 %v452_v24 }
 0x3a1   :  { %v448_v39 = vpop.f32.mrf.mxu1 }
 0x3a2   :  { %885 = vmatmul.mubr.f32.vlgmr.msra.gmra.mxu1 %v448_v39 }
 0x3a3   :  { %v851_v40 = vpop.f32.mrf.mxu1 }
 0x462   :  { %v541_v45 = vpop.f32.mrf.mxu1 }
 0x463   :  { %v542_v46 = vadd.f32 %v646_v44, %v541_v45 }
 0x464   :  { %v886_v47 = vpop.f32.mrf.mxu1 }
 0x465   :  { %v545_v48 = vmax.f32 %v542_v46, 0.0 }
 0x467   :  { %920 = vmatmul.mubr.f32.vlgmr.msra.gmra.mxu0 %v545_v48 }
 0x527   :  { %v635_v50 = vpop.f32.mrf.mxu0 }
 0x528   :  { %v636_v51 = vadd.f32 %v647_v49, %v635_v50 }
 0x529   :  { %v921_v52 = vpop.f32.mrf.mxu0 }
 0x52a   :  { %v639_v53 = vadd.f32 %v636_v51, %v1118_v34 }
 0x52c   :  { %640 = vst [vmem:[%s1351_s9] sm:$0xff] %v639_v53 }

</bundles_post_ra>
